<compile_context>
chip_gen: v5e
topology: v5e:2x2
jax: 0.10.0
libtpu: 0.0.40
codegen_flags: <defaults>
</compile_context>

<pallas_src>
import jax
import jax.numpy as jnp
from jax.experimental import pallas as pl
from jax.experimental.pallas import tpu as pltpu


def _round_up(x, mult):
    return ((x + mult - 1) // mult) * mult


def _pick_tn(Cp):
    """Largest multiple of 128 dividing Cp, capped at 512; for Cp>=256 also capped at
    Cp//2 so the leading 'parallel' class axis has >=2 blocks (v7x megacore)."""
    cap = 512
    if Cp >= 256:
        cap = min(cap, Cp // 2)
    best = 128
    tn = 128
    while tn <= cap:
        if Cp % tn == 0:
            best = tn
        tn += 128
    return best


def ensemble_kernel(x_ref, w_ref, b_ref, o_ref, acc_ref):
    """Grid = (batch tiles ['parallel'], class tiles ['parallel'], K tiles ['arbitrary']).

    x_ref: (TB, TK) bf16 -- w_m-scaled, model-concatenated activations
    w_ref: (TK, TN) bf16 -- model-concatenated weights
    b_ref: (1, TN)  f32  -- pre-combined bias sum_m w_m * b_m
    acc_ref: (TB, TN) f32 scratch accumulator (resident across the K axis)
    """
    k = pl.program_id(2)

    @pl.when(k == 0)
    def _init():
        acc_ref[...] = jnp.zeros_like(acc_ref)

    # MXU-accumulated partial matmul (f32 accumulation).
    acc_ref[...] += jnp.dot(x_ref[...], w_ref[...],
                            preferred_element_type=jnp.float32)

    @pl.when(k == pl.num_programs(2) - 1)
    def _finalize():
        o_ref[...] = (acc_ref[...] + b_ref[...]).astype(o_ref.dtype)


def prepare_ensemble(stacked_w, stacked_b, ens_weights, *, tk_cap=1024):
    """One-time ("model load") preparation: bf16 cast, model-concat reshape,
    lane padding, and the combined bias.  Keeps the per-call forward path free
    of W-sized pad/cast traffic.

    stacked_w: (M, F, C) f32, stacked_b: (M, C) f32, ens_weights: (M,) normalized.
    """
    M, F, C = stacked_w.shape
    K = M * F
    Cp = C if C % 128 == 0 else _round_up(C, 128)

    if K > tk_cap:
        TK = tk_cap                      # multiple of 128 => valid lane tile on x
        Kp = _round_up(K, TK)
    else:
        TK = K                           # single K block (full-dim block is allowed)
        Kp = K

    w_big = stacked_w.reshape(K, C).astype(jnp.bfloat16)
    if (Kp, Cp) != (K, C):
        w_big = jnp.zeros((Kp, Cp), jnp.bfloat16).at[:K, :C].set(w_big)

    b_sum = jnp.einsum("m,mc->c", ens_weights.astype(jnp.float32),
                       stacked_b.astype(jnp.float32))
    if Cp != C:
        b_sum = jnp.zeros((Cp,), jnp.float32).at[:C].set(b_sum)
    b_sum = b_sum.reshape(1, Cp)

    return dict(w_big=w_big, b_sum=b_sum,
                ens_weights=ens_weights.astype(jnp.float32),
                M=M, F=F, C=C, K=K, Kp=Kp, Cp=Cp, TK=TK)


def ensemble_forward(x, params, out_dtype=jnp.float32):
    """x: (B, F) -> (B, C) = sum_m ens_weights[m] * (x @ W_m + b_m)."""
    M, F, C = params["M"], params["F"], params["C"]
    K, Kp, Cp, TK = params["K"], params["Kp"], params["Cp"], params["TK"]
    B = x.shape[0]

    # Fold the ensemble weights into the (tiny) activations: x_big[b, m*F+f] = w_m*x[b,f].
    x_big = params["ens_weights"][:, None, None] * x.astype(jnp.float32)   # (M, B, F)
    x_big = jnp.transpose(x_big, (1, 0, 2)).reshape(B, K).astype(jnp.bfloat16)

    Bp0 = _round_up(B, 8)
    if Bp0 <= 256:
        TB, Bp = Bp0, Bp0
    else:
        TB = 256
        Bp = _round_up(B, TB)
    if (Bp, Kp) != (B, K):
        x_big = jnp.zeros((Bp, Kp), jnp.bfloat16).at[:B, :K].set(x_big)

    TN = _pick_tn(Cp)
    grid = (Bp // TB, Cp // TN, Kp // TK)

    out = pl.pallas_call(
        ensemble_kernel,
        out_shape=jax.ShapeDtypeStruct((Bp, Cp), out_dtype),
        grid=grid,
        in_specs=[
            pl.BlockSpec((TB, TK), lambda b, c, k: (b, k)),   # scaled activations
            pl.BlockSpec((TK, TN), lambda b, c, k: (k, c)),   # concatenated W (bf16 stream)
            pl.BlockSpec((1, TN), lambda b, c, k: (0, c)),    # combined bias
        ],
        out_specs=pl.BlockSpec((TB, TN), lambda b, c, k: (b, c)),  # lane-dense output
        scratch_shapes=[
            pltpu.VMEM((TB, TN), jnp.float32),                # f32 MXU accumulator
        ],
        compiler_params=pltpu.CompilerParams(
            dimension_semantics=("parallel", "parallel", "arbitrary"),
            vmem_limit_bytes=48 * 1024 * 1024),
    )(x_big, params["w_big"], params["b_sum"])

    return out[:B, :C]


if __name__ == "__main__":
    # 3 sub-models (Linear(F -> C) classifiers), batch=8, features=32, classes=16
    # TODO(synk): arbitrary sub-model backbones (e.g. Inception) are modeled as Linear heads.
    M, B, F, C = 3, 8, 32, 16
    key = jax.random.PRNGKey(0)
    kx, kw, kb = jax.random.split(key, 3)

    x = jax.random.normal(kx, (B, F), dtype=jnp.float32)
    stacked_w = jax.random.normal(kw, (M, F, C), dtype=jnp.float32) * 0.05
    stacked_b = jax.random.normal(kb, (M, C), dtype=jnp.float32) * 0.01

    # Unequal raw weights -> normalized to sum to 1 (matches PyTorch __init__)
    raw_weights = jnp.array([1.0, 2.0, 3.0], dtype=jnp.float32)
    ens_weights = raw_weights / jnp.sum(raw_weights)

    params = prepare_ensemble(stacked_w, stacked_b, ens_weights)   # one-time prep
    out = ensemble_forward(x, params)
    out = jax.block_until_ready(out)

    # Pure-JAX f32 reference: sum_m w_m * (x @ W_m + b_m)
    preds = jnp.einsum("bf,mfc->mbc", x, stacked_w) + stacked_b[:, None, :]
    ref = jnp.einsum("m,mbc->bc", ens_weights, preds)
    assert out.shape == ref.shape
    # bf16 inputs -> relaxed tolerance vs the f32 reference
    assert jnp.allclose(out, ref, atol=2e-2, rtol=2e-2), "mismatch vs reference"

    print("KERNEL_OK")
</pallas_src>

<mosaic_0001>
module attributes {stable_mosaic.version = 11 : i64} {
  func.func @ensemble_kernel(%arg0: i32, %arg1: i32, %arg2: i32, %arg3: memref<8x96xbf16, #tpu.memory_space<vmem>>, %arg4: memref<96x128xbf16, #tpu.memory_space<vmem>>, %arg5: memref<1x128xf32, #tpu.memory_space<vmem>>, %arg6: memref<8x128xf32, #tpu.memory_space<vmem>>, %arg7: memref<8x128xf32, #tpu.memory_space<vmem>>) attributes {dimension_semantics = [#tpu.dimension_semantics<parallel>, #tpu.dimension_semantics<parallel>, #tpu.dimension_semantics<arbitrary>], iteration_bounds = array<i64: 1, 1, 1>, scalar_prefetch = 0 : i64, scratch_operands = 1 : i64, tpu.core_type = #tpu.core_type<tc>, window_params = [{transform_indices = @transform_0, window_bounds = array<i64: 8, 96>}, {transform_indices = @transform_1, window_bounds = array<i64: 96, 128>}, {transform_indices = @transform_2, window_bounds = array<i64: 1, 128>}, {transform_indices = @transform_3, window_bounds = array<i64: 8, 128>}]} {
    %c0_i32 = arith.constant 0 : i32
    %0 = arith.cmpi eq, %arg2, %c0_i32 : i32
    %1 = arith.extui %0 : i1 to i32
    %c0_i32_0 = arith.constant 0 : i32
    %2 = arith.cmpi ne, %1, %c0_i32_0 : i32
    scf.if %2 {
      %cst_10 = arith.constant 0.000000e+00 : f32
      %12 = vector.broadcast %cst_10 : f32 to vector<8x128xf32>
      %c0_11 = arith.constant 0 : index
      %c0_12 = arith.constant 0 : index
      %13 = vector.load %arg7[%c0_11, %c0_12] : memref<8x128xf32, #tpu.memory_space<vmem>>, vector<8x128xf32>
      tpu.vector_store %arg7[%c0_11, %c0_12], %12 {strides = array<i32>} : memref<8x128xf32, #tpu.memory_space<vmem>>, vector<8x128xf32>,
    } else {
    }
    %c0 = arith.constant 0 : index
    %c0_1 = arith.constant 0 : index
    %3 = vector.load %arg7[%c0, %c0_1] : memref<8x128xf32, #tpu.memory_space<vmem>>, vector<8x128xf32>
    %c0_2 = arith.constant 0 : index
    %c0_3 = arith.constant 0 : index
    %4 = vector.load %arg3[%c0_2, %c0_3] : memref<8x96xbf16, #tpu.memory_space<vmem>>, vector<8x96xbf16>
    %c0_4 = arith.constant 0 : index
    %c0_5 = arith.constant 0 : index
    %5 = vector.load %arg4[%c0_4, %c0_5] : memref<96x128xbf16, #tpu.memory_space<vmem>>, vector<96x128xbf16>
    %cst = arith.constant dense<0.000000e+00> : vector<8x128xf32>
    %6 = tpu.matmul %4, %5, %cst {dimension_numbers = #tpu.dot_dimension_numbers<[1], [0], [0], [1], [0, 0, 1, 1], [], []>} : vector<8x96xbf16>, vector<96x128xbf16>, vector<8x128xf32> -> vector<8x128xf32>
    %7 = arith.addf %3, %6 : vector<8x128xf32>
    %c0_6 = arith.constant 0 : index
    %c0_7 = arith.constant 0 : index
    %8 = vector.load %arg7[%c0_6, %c0_7] : memref<8x128xf32, #tpu.memory_space<vmem>>, vector<8x128xf32>
    tpu.vector_store %arg7[%c0_6, %c0_7], %7 {strides = array<i32>} : memref<8x128xf32, #tpu.memory_space<vmem>>, vector<8x128xf32>,
    %c0_i32_8 = arith.constant 0 : i32
    %9 = arith.cmpi eq, %arg2, %c0_i32_8 : i32
    %10 = arith.extui %9 : i1 to i32
    %c0_i32_9 = arith.constant 0 : i32
    %11 = arith.cmpi ne, %10, %c0_i32_9 : i32
    scf.if %11 {
      %c0_10 = arith.constant 0 : index
      %c0_11 = arith.constant 0 : index
      %12 = vector.load %arg7[%c0_10, %c0_11] : memref<8x128xf32, #tpu.memory_space<vmem>>, vector<8x128xf32>
      %c0_12 = arith.constant 0 : index
      %c0_13 = arith.constant 0 : index
      %13 = vector.load %arg5[%c0_12, %c0_13] : memref<1x128xf32, #tpu.memory_space<vmem>>, vector<1x128xf32>
      %14 = vector.broadcast %13 : vector<1x128xf32> to vector<8x128xf32>
      %15 = arith.addf %12, %14 : vector<8x128xf32>
      %c0_14 = arith.constant 0 : index
      %c0_15 = arith.constant 0 : index
      %16 = vector.load %arg6[%c0_14, %c0_15] : memref<8x128xf32, #tpu.memory_space<vmem>>, vector<8x128xf32>
      tpu.vector_store %arg6[%c0_14, %c0_15], %15 {strides = array<i32>} : memref<8x128xf32, #tpu.memory_space<vmem>>, vector<8x128xf32>,
    } else {
    }
    return
  }
  func.func @transform_0(%arg0: i32, %arg1: i32, %arg2: i32) -> (i32, i32) {
    %c0_i32 = arith.constant 0 : i32
    return %arg0, %arg2 : i32, i32
  }
  func.func @transform_1(%arg0: i32, %arg1: i32, %arg2: i32) -> (i32, i32) {
    %c0_i32 = arith.constant 0 : i32
    return %arg2, %arg1 : i32, i32
  }
  func.func @transform_2(%arg0: i32, %arg1: i32, %arg2: i32) -> (i32, i32) {
    %c0_i32 = arith.constant 0 : i32
    %c0_i32_0 = arith.constant 0 : i32
    return %c0_i32, %arg1 : i32, i32
  }
  func.func @transform_3(%arg0: i32, %arg1: i32, %arg2: i32) -> (i32, i32) {
    %c0_i32 = arith.constant 0 : i32
    return %arg0, %arg1 : i32, i32
  }
}

</mosaic_0001>

<bundles_post_ra>
// kernel: tpu_custom_call.1
= control target key start
LH: loop header
LB: loop body
LE: loop exit
PB: predicated region body
PF: predicated region fallthrough
CT: control target
= control target key end

     0   :  { %8 = vsyncpa [#allocation4], 0  ;;  %s300_s0 = inlined_call_operand.hbm [shape: bf16[8,96], index: 0, kind: input, shape index: {}]   ;;  %s301_s1 = inlined_call_operand.hbm [shape: bf16[96,128], index: 1, kind: input, shape index: {}]   ;;  %s302_s2 = inlined_call_operand.vmem [shape: f32[1,128], index: 2, kind: input, shape index: {}]   ;;  %s303_s3 = inlined_call_operand.hbm [shape: f32[8,128], index: 3, kind: output, shape index: {}]  }
   0x1   :  { %9 = vsyncpa [#allocation7], 0 }
   0x2   :  { %10 = vsyncpa [#allocation5], 0  ;;  %s16_s14 = sshll.u32 %s300_s0, 4  ;;  %s263_s15 = smov [#allocation3]   ;;  %s17_s14 = int_to_ptr.hbm [resolvable:$true] %s16_s14 }
   0x3   :  { %s18_s16 = sshll.u32 %s263_s15, 4  ;;  %s26_s19 = sshll.u32 %s301_s1, 4  ;;  %s19_s16 = int_to_ptr.vmem [resolvable:$true] %s18_s16  ;;  %s27_s19 = int_to_ptr.hbm [resolvable:$true] %s26_s19 }
   0x4   :  { %21 = dma.hbm_to_vmem [thread:$0]  %s17_s14, 64, %s19_s16, [#allocation4]  }
   0x5   :  { %s264_s20 = smov [#allocation6]   ;;  %s265_s22 = smov 64  }
   0x6   :  { %s28_s21 = sshll.u32 %s264_s20, 4  ;;  %s266_s23 = smov 4   ;;  %s29_s21 = int_to_ptr.vmem [resolvable:$true] %s28_s21 }
   0x7   :  { %34 = dma.hbm_to_vmem [thread:$0]  %s27_s19, 768, %s29_s21, [#allocation7], %s265_s22, %s265_s22, %s266_s23  }
   0x8   :  { %257 = dma.done.wait [#allocation4], 64  }
   0x9   :  { %258 = vsyncadd [#allocation4], 4294967232 }
   0xa   :  { %259 = dma.done.wait [#allocation7], 768  }
   0xb   :  { %260 = vsyncadd [#allocation7], 4294966528  ;;  %v178_v0 = vld [vmem:[#allocation6 + $0x28] sm:$0xff]  ;;  %v177_v1 = vld [vmem:[#allocation6 + $0x20] sm:$0xff]  ;;  %vm101_vm0 = vcmask 785408   ;;  %s267_s24 = smov [#allocation8]  }
   0xc   :  { %107 = vmatpush.bf16.msra.mxu0 %v178_v0  ;;  %v176_v2 = vld [vmem:[#allocation6 + $0x18] sm:$0xff]  ;;  %v175_v3 = vld [vmem:[#allocation6 + $0x10] sm:$0xff]  ;;  %v174_v4 = vld [vmem:[#allocation6 + $0x8] sm:$0xff]  ;;  %s135_s25 = sshll.u32 %s267_s24, 4  ;;  %s137_s28 = sshll.u32 %s303_s3, 4  ;;  %s136_s25 = int_to_ptr.vmem [resolvable:$true] %s135_s25  ;;  %s138_s28 = int_to_ptr.hbm [resolvable:$true] %s137_s28 }
   0xd   :  { %v173_v5 = vld [vmem:[#allocation6] sm:$0xff]  ;;  %v52_v6 = vld [vmem:[#allocation3] sm:$0xf] }
   0xe   :  { %v184_v7 = vld [vmem:[%s302_s2] ss:$0 sm:$0xff] }
  0x10   :  { %108 = vmatpush.bf16.msra.mxu0 %v177_v1 }
  0x14   :  { %109 = vmatpush.bf16.msra.mxu0 %v176_v2 }
  0x18   :  { %110 = vmatpush.bf16.msra.mxu0 %v175_v3 }
  0x1c   :  { %111 = vmatpush.bf16.msra.mxu0 %v174_v4 }
  0x20   :  { %112 = vmatpush.bf16.msra.mxu0 %v173_v5 }
  0x23   :  { %172 = vmatmul.msk.bf16.vlgmr.msra.gmra.mxu0 %vm101_vm0, %v52_v6 }
  0xa0   :  { %v114_v8 = vpop.f32.mrf.mxu0 }
  0xa1   :  { %v128_v9 = vadd.f32 %v184_v7, %v114_v8 }
  0xa3   :  { %129 = vst [vmem:[#allocation8] sm:$0xff] %v128_v9 }
  0xa4   :  { %140 = dma.vmem_to_hbm [thread:$0]  %s136_s25, 128, %s138_s28, [#allocation5]  }
  0xa8   :  { %v116_v10 = vpop.f32.mrf.mxu0 }
  0xa9   :  { %261 = dma.done.wait [#allocation5], 128  }
  0xaa   :  { %262 = vsyncadd [#allocation5], 4294967168 }
  0xab   :  { %145 = vsyncpa [#allocation4], 1 }
  0xac   :  { %146 = vsyncpa [#allocation7], 1 }
  0xad   :  { %147 = vsyncpa [#allocation5], 1 }

</bundles_post_ra>
